<compile_context>
chip_gen: v7x
topology: tpu7x:2x2x1
jax: 0.10.0
libtpu: 0.0.40
codegen_flags: <defaults>
</compile_context>

<pallas_src>
import functools

import jax
import jax.numpy as jnp
from jax.experimental import pallas as pl
from jax.experimental.pallas import tpu as pltpu


_LANE = 128
_SUBLANE = 8
_MAX_TM = 8192                       # cap on row-tile height (budget rules first)
_MAX_PACKED_W_BYTES = 8 * 1024 * 1024


def _matmul_kernel(x_ref, w_ref, o_ref):
    # x_ref: (tm, Np) rows, w_ref: (Np, td) weight tile, o_ref: (tm, td) out.
    o_ref[...] = jnp.dot(
        x_ref[...], w_ref[...], preferred_element_type=jnp.float32
    ).astype(o_ref.dtype)


def _round_up(a, b):
    return ((a + b - 1) // b) * b


def _sublane(dtype):
    # f32 -> 8, bf16 -> 16, int8/fp8 -> 32 rows per sublane tile.
    it = jnp.dtype(dtype).itemsize
    return max(_SUBLANE, 32 // max(it, 1))


def _vmem_budgets():
    """Generation-aware (vmem_limit_bytes, per-step block budget)."""
    cap = None
    try:
        info = pltpu.get_tpu_info()
        cap = getattr(info, "vmem_capacity_bytes", None)
    except Exception:
        cap = None
    if cap is None:
        cap = 64 * 1024 * 1024               # conservative fallback (v7x-sized)
    vmem_limit = min(48 * 1024 * 1024, int(cap) // 2)   # 48 MiB v5e/v6e, 32 MiB v7x
    vmem_limit = max(vmem_limit, 16 * 1024 * 1024)
    block_budget = max(vmem_limit // 2, 8 * 1024 * 1024)  # 24 MiB / 16 MiB
    return vmem_limit, block_budget


def _choose_tm(m_rows, per_row_bytes, resident_bytes, block_budget, sub):
    """Largest row tile (multiple of `sub`) whose pipeline buffers fit."""
    budget = max(block_budget - resident_bytes, 1 << 20)
    tm = budget // max(per_row_bytes, 1)
    tm = min(tm, _MAX_TM)
    if tm >= m_rows:
        return int(m_rows)                   # single full-height block is legal
    tm = max(sub, (tm // sub) * sub)
    return int(min(tm, m_rows))


def _apply_core_split(tm, m_rows, sub):
    """Cap tm so there are >=2 (ideally 4) row tiles -> both v7x TCs get work.

    Costs only ~0.35us per extra grid step on single-core parts.
    """
    for splits in (4, 2):
        if m_rows >= splits * sub:
            cap = _round_up(-(-m_rows // splits), sub)
            return int(min(tm, cap))
    return int(tm)


def _pick_pack_factor(m_rows, n, d, w_itemsize):
    """Lane-packing factor r: fold r rows into one 128-lane output row."""
    if d >= _LANE or d <= 0 or _LANE % d != 0:
        return 1
    r = _LANE // d
    while r > 1 and m_rows % r != 0:
        r //= 2
    # Guard: don't let the r^2-inflated block-diagonal weight get large.
    while r > 1 and (r * n) * (r * d) * w_itemsize > _MAX_PACKED_W_BYTES:
        r //= 2
    return r


def _pack_weight(w, r):
    """Exact block-diagonal replication: (x2d @ w_p).reshape(M, D) == x2d0 @ w."""
    if r == 1:
        return w
    n, d = w.shape
    eye = jnp.eye(r, dtype=w.dtype)
    return jnp.einsum("ij,nd->injd", eye, w).reshape(r * n, r * d)


@functools.partial(jax.jit, static_argnames=("out_dtype",))
def _wr_forward(x, w_p, *, out_dtype):
    B, T, N = x.shape
    Np, Dp = w_p.shape
    r = Np // N
    D = Dp // r
    M = B * T
    Mp = M // r

    # Row-major contiguous reshape: pure bitcast.
    x2d = x.reshape(Mp, Np)

    x_it = jnp.dtype(x.dtype).itemsize
    w_it = jnp.dtype(w_p.dtype).itemsize
    o_it = jnp.dtype(out_dtype).itemsize

    vmem_limit, block_budget = _vmem_budgets()
    sub = max(_sublane(x.dtype), _sublane(out_dtype))

    # Physical (padded) sizes for VMEM accounting.
    Np_lane = _round_up(Np, _LANE)                 # x block's lane (last) dim
    Np_sub_w = _round_up(Np, _sublane(w_p.dtype))  # w block's sublane dim
    Dp_lane = _round_up(Dp, _LANE)

    # ---- D tiling: only when the double-buffered resident weight is too big.
    weight_budget = block_budget // 2
    full_w_bytes = 2 * Np_sub_w * Dp_lane * w_it
    if full_w_bytes > weight_budget and Dp > _LANE:
        td = max(_LANE, ((weight_budget // max(2 * Np_sub_w * w_it, 1)) // _LANE) * _LANE)
        td = min(td, Dp_lane)
    else:
        td = Dp
    grid_d = pl.cdiv(Dp, td)
    td_lane = _round_up(td, _LANE)
    # TODO(synk): add K (c_in) tiling with a VMEM accumulator (pl.when init /
    # finalize) if c_in ever grows so large that the weight itself cannot fit.

    # ---- row tile: padded accounting + f32 MXU result staging (tm*td*4).
    w_block_bytes = 2 * Np_sub_w * td_lane * w_it
    per_row_bytes = 2 * (Np_lane * x_it + td_lane * o_it) + td_lane * 4
    tm = _choose_tm(Mp, per_row_bytes, w_block_bytes, block_budget, sub)
    tm = _apply_core_split(tm, Mp, sub)
    grid_m = pl.cdiv(Mp, tm)

    # ---- grid order: re-stream the smaller operand.
    x_stream = Mp * Np_lane * x_it
    w_stream = Np_sub_w * Dp_lane * w_it
    extra_d_outer = (grid_d - 1) * x_stream              # x re-read per d tile
    extra_m_outer = 0 if grid_d == 1 else (grid_m - 1) * w_stream  # w re-read per row tile
    d_outer = extra_d_outer < extra_m_outer

    if d_outer:
        grid = (grid_d, grid_m)
        in_specs = [pl.BlockSpec((tm, Np), lambda j, i: (i, 0)),
                    pl.BlockSpec((Np, td), lambda j, i: (0, j))]
        out_spec = pl.BlockSpec((tm, td), lambda j, i: (i, j))
        dims = ("arbitrary", "parallel")    # 2-TC split lands on the row axis
    else:
        grid = (grid_m, grid_d)
        in_specs = [pl.BlockSpec((tm, Np), lambda i, j: (i, 0)),
                    pl.BlockSpec((Np, td), lambda i, j: (0, j))]
        out_spec = pl.BlockSpec((tm, td), lambda i, j: (i, j))
        dims = ("parallel", "arbitrary")

    cost = pl.CostEstimate(
        flops=2 * M * N * D,
        transcendentals=0,
        bytes_accessed=int(
            (grid_d if d_outer else 1) * M * Np * x_it          # x (re-)reads
            + (1 if (d_outer or grid_d == 1) else grid_m) * Np * Dp * w_it
            + M * D * o_it),
    )

    out2d = pl.pallas_call(
        _matmul_kernel,
        out_shape=jax.ShapeDtypeStruct((Mp, Dp), out_dtype),
        grid_spec=pltpu.PrefetchScalarGridSpec(
            num_scalar_prefetch=0,
            grid=grid,
            in_specs=in_specs,
            out_specs=out_spec,
        ),
        compiler_params=pltpu.CompilerParams(
            dimension_semantics=dims,
            vmem_limit_bytes=vmem_limit,
        ),
        cost_estimate=cost,
    )(x2d, w_p)

    # (Mp, Dp) row-major is the same contiguous memory as (M, D): free reshape.
    return out2d.reshape(B, T, D)


class WrNodeEmbedding:
    """Pallas-TPU port of the PyTorch Wr_node_embedding module.

    Holds the (c_in, d_model) weight and memoizes the lane-packed
    (block-diagonal) copy per packing factor r, so it is built and pushed to
    HBM once per weight rather than on every forward call.

    Tip: pass out_dtype=jnp.bfloat16 (and bf16 x / w) — the M*D output stream
    dominates HBM traffic; accumulation stays f32.
    """

    def __init__(self, w):
        assert w.ndim == 2, "weight must be (c_in, d_model)"
        self.w = w
        self._packed = {}   # r -> packed weight

    def _packed_weight(self, r):
        wp = self._packed.get(r)
        if wp is None:
            wp = _pack_weight(self.w, r)
            self._packed[r] = wp
        return wp

    def __call__(self, x, out_dtype=None):
        B, T, N = x.shape
        Nw, D = self.w.shape
        assert N == Nw, f"c_in mismatch: x has {N}, w has {Nw}"
        if out_dtype is None:
            out_dtype = x.dtype
        r = _pick_pack_factor(B * T, N, D, jnp.dtype(self.w.dtype).itemsize)
        w_p = self._packed_weight(r)
        return _wr_forward(x, w_p, out_dtype=jnp.dtype(out_dtype))


def wr_node_embedding(x, w, *, out_dtype=None):
    """One-shot functional form (re-packs the weight each call; prefer
    WrNodeEmbedding for repeated use so the packed weight is cached)."""
    if out_dtype is None:
        out_dtype = x.dtype
    B, T, N = x.shape
    r = _pick_pack_factor(B * T, N, w.shape[1], jnp.dtype(w.dtype).itemsize)
    return _wr_forward(x, _pack_weight(w, r), out_dtype=jnp.dtype(out_dtype))


if __name__ == "__main__":
    # Small shapes consistent with the module: x (B, T, c_in), w (c_in, d_model)
    B, T, N, D = 2, 8, 4, 32

    key = jax.random.PRNGKey(0)
    kx, kw = jax.random.split(key)
    x = jax.random.normal(kx, (B, T, N), dtype=jnp.float32)
    # Deterministic init matching nn.Parameter(torch.randn((c_in, d_model)))
    w = jax.random.normal(kw, (N, D), dtype=jnp.float32)

    emb = WrNodeEmbedding(w)
    out = jax.block_until_ready(emb(x))

    # Sanity check against plain-JAX reference (same einsum semantics).
    ref = jnp.einsum("btn,nd->btd", x, w)
    assert out.shape == (B, T, D)
    assert jnp.allclose(out, ref, atol=1e-5, rtol=1e-5)

    # Second call reuses the cached packed weight and compiled executable.
    out2 = jax.block_until_ready(emb(x))
    assert jnp.allclose(out2, ref, atol=1e-5, rtol=1e-5)

    print("KERNEL_OK")
</pallas_src>

<mosaic_0001>
module attributes {stable_mosaic.version = 11 : i64} {
  func.func @_matmul_kernel(%arg0: i32, %arg1: i32, %arg2: memref<4x16xf32, #tpu.memory_space<vmem>>, %arg3: memref<16x128xf32, #tpu.memory_space<vmem>>, %arg4: memref<4x128xf32, #tpu.memory_space<vmem>>) attributes {dimension_semantics = [#tpu.dimension_semantics<parallel>, #tpu.dimension_semantics<arbitrary>], iteration_bounds = array<i64: 1, 1>, scalar_prefetch = 0 : i64, scratch_operands = 0 : i64, tpu.core_type = #tpu.core_type<tc>, window_params = [{transform_indices = @transform_0, window_bounds = array<i64: 4, 16>}, {transform_indices = @transform_1, window_bounds = array<i64: 16, 128>}, {transform_indices = @transform_2, window_bounds = array<i64: 4, 128>}]} {
    %c0 = arith.constant 0 : index
    %c0_0 = arith.constant 0 : index
    %0 = vector.load %arg2[%c0, %c0_0] : memref<4x16xf32, #tpu.memory_space<vmem>>, vector<4x16xf32>
    %c0_1 = arith.constant 0 : index
    %c0_2 = arith.constant 0 : index
    %1 = vector.load %arg3[%c0_1, %c0_2] : memref<16x128xf32, #tpu.memory_space<vmem>>, vector<16x128xf32>
    %cst = arith.constant dense<0.000000e+00> : vector<4x128xf32>
    %2 = tpu.matmul %0, %1, %cst {dimension_numbers = #tpu.dot_dimension_numbers<[1], [0], [0], [1], [0, 0, 1, 1], [], []>} : vector<4x16xf32>, vector<16x128xf32>, vector<4x128xf32> -> vector<4x128xf32>
    %c0_3 = arith.constant 0 : index
    %c0_4 = arith.constant 0 : index
    %3 = vector.load %arg4[%c0_3, %c0_4] : memref<4x128xf32, #tpu.memory_space<vmem>>, vector<4x128xf32>
    tpu.vector_store %arg4[%c0_3, %c0_4], %2 {strides = array<i32>} : memref<4x128xf32, #tpu.memory_space<vmem>>, vector<4x128xf32>,
    return
  }
  func.func @transform_0(%arg0: i32, %arg1: i32) -> (i32, i32) {
    %c0_i32 = arith.constant 0 : i32
    %c0_i32_0 = arith.constant 0 : i32
    return %arg0, %c0_i32 : i32, i32
  }
  func.func @transform_1(%arg0: i32, %arg1: i32) -> (i32, i32) {
    %c0_i32 = arith.constant 0 : i32
    %c0_i32_0 = arith.constant 0 : i32
    return %c0_i32, %arg1 : i32, i32
  }
  func.func @transform_2(%arg0: i32, %arg1: i32) -> (i32, i32) {
    %c0_i32 = arith.constant 0 : i32
    return %arg0, %arg1 : i32, i32
  }
}

</mosaic_0001>

<bundles_post_ra>
// kernel: _wr_forward.1
= control target key start
LH: loop header
LB: loop body
LE: loop exit
PB: predicated region body
PF: predicated region fallthrough
CT: control target
= control target key end

     0   :  { %v110_v0 = vmov 0.0|0.0   ;;  %vm111_vm0 = vmmov 0   ;;  %v112_v3 = vmov 0.0   ;;  %vm14_vm1 = vcmask 130048   ;;  %s140_s1 = inlined_call_operand.vmem [shape: f32[16,128], index: 1, kind: input, shape index: {}]   ;;  %s141_s0 = inlined_call_operand.vmem [shape: f32[4,16], index: 0, kind: input, shape index: {}]   ;;  %s142_s2 = inlined_call_operand.vmem [shape: f32[4,128], index: 2, kind: output, shape index: {}]  }
   0x1   :  { %104 = vmatprep.subr.bf16.mxu0 %v110_v0  ;;  %v12_v1 = vld [vmem:[%s140_s1] sm:$0xff]  ;;  %v13_v2 = vld [vmem:[%s140_s1 + $0x8] sm:$0xff]  ;;  %101 = vmatprep.mubr.msk.f32.mxu0 %vm111_vm0, %v112_v3 }
   0x2   :  { %v105_v4 = vpack.c.bf16 %v13_v2, %v12_v1  ;;  %v11_v5 = vld [vmem:[%s141_s0] sm:$0xf] }
   0x4   :  { %106 = vmatpush3.bf16.msra.mxu0 %v105_v4 }
   0x7   :  { %102 = vmatmul.mubr.msk.f32.vlgmr.msra.gmra.mrb[0].mxu0 %vm14_vm1, %v11_v5 }
  0xda   :  { %v84_v6 = vpop.f32.mrb[0].mxu0 }
  0xdb   :  { %88 = vst [vmem:[%s142_s2] sm:$0xf] %v84_v6  ;;  %v103_v7 = vpop.f32.mrb[1].mxu0 }

</bundles_post_ra>
